<compile_context>
chip_gen: v7x
topology: tpu7x:2x2x1
jax: 0.10.0
libtpu: 0.0.40
codegen_flags: <defaults>
</compile_context>

<pallas_src>
import functools
from typing import NamedTuple

import jax
import jax.numpy as jnp
from jax.experimental import pallas as pl
from jax.experimental.pallas import tpu as pltpu

_LANE = 128      # lane width of a vreg
_SUBLANE = 8     # sublane count of an f32 vreg
_BIAS_ROWS = 8   # rows reserved in the slab for (b1, b2)


def _round_up(n: int, m: int) -> int:
    return ((n + m - 1) // m) * m


class StrategyDims(NamedTuple):
    """Static layout record for a packed parameter slab (hashable -> jit-static)."""
    in_dim: int
    hidden: int
    out_dim: int
    in_rows: int   # sublane-padded W1 row count (= K of the first dot)
    h_rows: int    # sublane-padded W2 row count stored in the slab
    cols: int      # lane-padded width of the slab / hidden / output
    rows: int      # total slab rows


def _strategy_mlp_kernel(x_ref, p_ref, o_ref, *, in_rows: int, hidden: int):
    """Fused MLP: relu(x @ W1 + b1) @ W2 + b2, everything resident in VMEM.

    x_ref: [batch_pad, in_rows] f32 (zero padded)
    p_ref: [rows, cols] packed parameter slab (bf16 or f32):
        rows [0, in_rows)                       -> W1 (zero padded)
        row  in_rows                            -> b1 (zero padded)
        row  in_rows + 1                        -> b2 (zero padded)
        rows [in_rows + 8, in_rows + 8 + h_rows)-> W2 (zero padded)
    o_ref: [batch_pad, cols] f32 (lane-dense store)
    """
    w1 = p_ref[0:in_rows, :]                                    # [in_rows, cols]
    b1 = p_ref[in_rows:in_rows + 1, :]                          # [1, cols]
    b2 = p_ref[in_rows + 1:in_rows + 2, :]                      # [1, cols]
    w2_row0 = in_rows + _BIAS_ROWS
    w2 = p_ref[w2_row0:w2_row0 + hidden, :]                     # [hidden, cols]

    # Layer 1: bf16 x bf16 MXU matmul with f32 accumulation, bias + ReLU on VPU.
    x = x_ref[...].astype(w1.dtype)
    h = jnp.dot(x, w1, preferred_element_type=jnp.float32)      # [bp, cols] f32
    h = jnp.maximum(h + b1.astype(jnp.float32), 0.0)

    # Layer 2: contract only over the real `hidden` rows (h[:, hidden:] == 0).
    h2 = h[:, :hidden].astype(w2.dtype)                         # [bp, hidden]
    o = jnp.dot(h2, w2, preferred_element_type=jnp.float32)     # [bp, cols] f32
    o = o + b2.astype(jnp.float32)
    o_ref[...] = o.astype(o_ref.dtype)


def pack_strategy_params(w1, b1, w2, b2, *, dtype=jnp.bfloat16):
    """Pack (W1, b1, W2, b2) into one lane-dense slab. Call once per policy.

    w1: [in_dim, hidden], b1: [hidden], w2: [hidden, out_dim], b2: [out_dim]
    Returns (slab, dims) where slab is [in_rows + 8 + h_rows, cols] in `dtype`
    (bf16 by default: half the per-call DMA, native MXU path) and dims is the
    static layout record consumed by strategy_forward.
    """
    in_dim, hidden = w1.shape
    out_dim = w2.shape[1]
    in_rows = _round_up(in_dim, _SUBLANE)
    h_rows = _round_up(hidden, _SUBLANE)
    cols = max(_round_up(hidden, _LANE), _round_up(out_dim, _LANE))
    rows = in_rows + _BIAS_ROWS + h_rows

    slab = jnp.zeros((rows, cols), dtype)
    slab = slab.at[:in_dim, :hidden].set(w1.astype(dtype))
    slab = slab.at[in_rows, :hidden].set(b1.astype(dtype))
    slab = slab.at[in_rows + 1, :out_dim].set(b2.astype(dtype))
    w2_row0 = in_rows + _BIAS_ROWS
    slab = slab.at[w2_row0:w2_row0 + hidden, :out_dim].set(w2.astype(dtype))

    dims = StrategyDims(in_dim, hidden, out_dim, in_rows, h_rows, cols, rows)
    return slab, dims


@functools.partial(jax.jit, static_argnames=("dims",))
def strategy_forward(x, packed_params, dims: StrategyDims):
    """Forward pass equivalent to Strategy.forward.

    x:             [batch, in_dim] float32
    packed_params: slab produced by pack_strategy_params
    dims:          the StrategyDims returned alongside that slab
    returns pdparam [batch, out_dim] float32
    """
    batch, in_dim = x.shape
    # Trace-time consistency checks: a mismatched slab raises, never mis-slices.
    if in_dim != dims.in_dim:
        raise ValueError(f"x has in_dim={in_dim}, slab was packed for {dims.in_dim}")
    if tuple(packed_params.shape) != (dims.rows, dims.cols):
        raise ValueError(
            f"packed_params shape {packed_params.shape} != expected {(dims.rows, dims.cols)}")

    batch_pad = _round_up(max(batch, 1), _SUBLANE)
    # At most ONE wrapper-side op before the kernel: a zero pad for alignment.
    if (batch_pad, dims.in_rows) != (batch, in_dim):
        x = jnp.pad(x, ((0, batch_pad - batch), (0, dims.in_rows - in_dim)))

    kernel = functools.partial(
        _strategy_mlp_kernel, in_rows=dims.in_rows, hidden=dims.hidden)
    out = pl.pallas_call(
        kernel,
        out_shape=jax.ShapeDtypeStruct((batch_pad, dims.cols), jnp.float32),
        in_specs=[
            pl.BlockSpec(memory_space=pltpu.MemorySpace.VMEM),
            pl.BlockSpec(memory_space=pltpu.MemorySpace.VMEM),
        ],
        out_specs=pl.BlockSpec(memory_space=pltpu.MemorySpace.VMEM),
    )(x, packed_params)

    # Strip lane/sublane padding.  Fuse the downstream Categorical log-softmax
    # into this same jit in a real rollout loop so this slice rides along with
    # real work instead of being a standalone launch.
    return out[:batch, :dims.out_dim]


def init_strategy_params(key, in_dim, out_dim, hidden=64):
    """Deterministic init mimicking nn.Linear's default U(-1/sqrt(fan_in), +)."""
    k1, k2, k3, k4 = jax.random.split(key, 4)
    lim1 = 1.0 / jnp.sqrt(jnp.float32(in_dim))
    lim2 = 1.0 / jnp.sqrt(jnp.float32(hidden))
    w1 = jax.random.uniform(k1, (in_dim, hidden), jnp.float32, -lim1, lim1)
    b1 = jax.random.uniform(k2, (hidden,), jnp.float32, -lim1, lim1)
    w2 = jax.random.uniform(k3, (hidden, out_dim), jnp.float32, -lim2, lim2)
    b2 = jax.random.uniform(k4, (out_dim,), jnp.float32, -lim2, lim2)
    return w1, b1, w2, b2


if __name__ == "__main__":
    # Typical REINFORCE/CartPole-like sizes: state dim 4, 2 actions, batch of 8.
    in_dim, out_dim, hidden, batch = 4, 2, 64, 8

    key = jax.random.PRNGKey(0)
    kx, kp = jax.random.split(key)
    x = jax.random.normal(kx, (batch, in_dim), jnp.float32)
    w1, b1, w2, b2 = init_strategy_params(kp, in_dim, out_dim, hidden)

    # Pure-JAX f32 reference of the original module's forward.
    ref = jnp.maximum(x @ w1 + b1, 0.0) @ w2 + b2

    # 1) Exact-semantics path: f32 slab, tight tolerance against the reference.
    slab32, dims32 = pack_strategy_params(w1, b1, w2, b2, dtype=jnp.float32)
    pd32 = jax.block_until_ready(strategy_forward(x, slab32, dims32))
    assert pd32.shape == (batch, out_dim)
    assert jnp.allclose(pd32, ref, atol=1e-4, rtol=1e-4)

    # 2) Performance path (default): bf16 slab — identical forward structure,
    #    tolerance accounts for bf16 weight rounding only.
    slab16, dims16 = pack_strategy_params(w1, b1, w2, b2)  # bf16 by default
    pd16 = jax.block_until_ready(strategy_forward(x, slab16, dims16))
    assert pd16.shape == (batch, out_dim)
    assert jnp.allclose(pd16, ref, atol=5e-2, rtol=5e-2)

    # TODO(synk): .act() (Categorical sampling / log_prob bookkeeping, optimizer)
    # is host-side RL glue, not part of the forward hot path; fuse its log-softmax
    # into the consumer jit rather than into this kernel.
    print("KERNEL_OK")
</pallas_src>

<mosaic_0001>
module attributes {stable_mosaic.version = 11 : i64} {
  func.func @_strategy_mlp_kernel(%arg0: memref<8x8xf32, #tpu.memory_space<vmem>>, %arg1: memref<80x128xf32, #tpu.memory_space<vmem>>, %arg2: memref<8x128xf32, #tpu.memory_space<vmem>>) attributes {dimension_semantics = [], scalar_prefetch = 0 : i64, scratch_operands = 0 : i64, tpu.core_type = #tpu.core_type<tc>} {
    %c0 = arith.constant 0 : index
    %c0_0 = arith.constant 0 : index
    %0 = vector.load %arg1[%c0, %c0_0] : memref<80x128xf32, #tpu.memory_space<vmem>>, vector<8x128xf32>
    %c8 = arith.constant 8 : index
    %c0_1 = arith.constant 0 : index
    %1 = vector.load %arg1[%c8, %c0_1] : memref<80x128xf32, #tpu.memory_space<vmem>>, vector<1x128xf32>
    %c9 = arith.constant 9 : index
    %c0_2 = arith.constant 0 : index
    %2 = vector.load %arg1[%c9, %c0_2] : memref<80x128xf32, #tpu.memory_space<vmem>>, vector<1x128xf32>
    %c16 = arith.constant 16 : index
    %c0_3 = arith.constant 0 : index
    %3 = vector.load %arg1[%c16, %c0_3] : memref<80x128xf32, #tpu.memory_space<vmem>>, vector<64x128xf32>
    %c0_4 = arith.constant 0 : index
    %c0_5 = arith.constant 0 : index
    %4 = vector.load %arg0[%c0_4, %c0_5] : memref<8x8xf32, #tpu.memory_space<vmem>>, vector<8x8xf32>
    %cst = arith.constant dense<0.000000e+00> : vector<8x128xf32>
    %5 = tpu.matmul %4, %0, %cst {dimension_numbers = #tpu.dot_dimension_numbers<[1], [0], [0], [1], [0, 0, 1, 1], [], []>} : vector<8x8xf32>, vector<8x128xf32>, vector<8x128xf32> -> vector<8x128xf32>
    %6 = vector.broadcast %1 : vector<1x128xf32> to vector<8x128xf32>
    %7 = arith.addf %5, %6 : vector<8x128xf32>
    %cst_6 = arith.constant 0.000000e+00 : f32
    %8 = vector.broadcast %cst_6 : f32 to vector<8x128xf32>
    %9 = arith.maximumf %7, %8 : vector<8x128xf32>
    %10 = vector.extract_strided_slice %9 {offsets = [0, 0], sizes = [8, 64], strides = [1, 1]} : vector<8x128xf32> to vector<8x64xf32>
    %cst_7 = arith.constant dense<0.000000e+00> : vector<8x128xf32>
    %11 = tpu.matmul %10, %3, %cst_7 {dimension_numbers = #tpu.dot_dimension_numbers<[1], [0], [0], [1], [0, 0, 1, 1], [], []>} : vector<8x64xf32>, vector<64x128xf32>, vector<8x128xf32> -> vector<8x128xf32>
    %12 = vector.broadcast %2 : vector<1x128xf32> to vector<8x128xf32>
    %13 = arith.addf %11, %12 : vector<8x128xf32>
    %c0_8 = arith.constant 0 : index
    %c0_9 = arith.constant 0 : index
    %14 = vector.load %arg2[%c0_8, %c0_9] : memref<8x128xf32, #tpu.memory_space<vmem>>, vector<8x128xf32>
    tpu.vector_store %arg2[%c0_8, %c0_9], %13 {strides = array<i32>} : memref<8x128xf32, #tpu.memory_space<vmem>>, vector<8x128xf32>,
    return
  }
}

</mosaic_0001>

<bundles_post_ra>
// kernel: strategy_forward.1
= control target key start
LH: loop header
LB: loop body
LE: loop exit
PB: predicated region body
PF: predicated region fallthrough
CT: control target
= control target key end

     0   :  { %7 = vsyncpa [#allocation3], 0  ;;  %s281_s9 = smov [#allocation2]   ;;  %s320_s0 = inlined_call_operand.vmem [shape: f32[8,8], index: 0, kind: input, shape index: {}]   ;;  %s321_s1 = inlined_call_operand.hbm [shape: f32[80,128], index: 1, kind: input, shape index: {}]   ;;  %s322_s2 = inlined_call_operand.vmem [shape: f32[8,128], index: 2, kind: output, shape index: {}]  }
   0x1   :  { %s15_s10 = sshll.u32 %s281_s9, 4  ;;  %s257_s13 = scalar_lea.hbm %s321_s1, 1280  ;;  %s16_s10 = int_to_ptr.vmem [resolvable:$true] %s15_s10 }
   0x2   :  { %p258_p0 = scmp.ne.s32.totalorder %s321_s1, %s257_s13  ;;  %p261_p1 = scmp.lt.u32.totalorder %s257_s13, %s321_s1 }
   0x4   :  { %p263_p2 = pnand %p261_p1, %p258_p0 }
   0x6   :  { %266 = shalt.err (!%p263_p2)
}
   0x7   :  { %s267_s18 = scalar_lea.vmem %s16_s10, 1280  ;;  %p272_p4 = scmp.lt.s32.totalorder %s16_s10, %s16_s10 }
   0x8   :  { %p268_p3 = scmp.ne.s32.totalorder %s16_s10, %s267_s18  ;;  %p273_p5 = scmp.lt.s32.totalorder %s267_s18, %s267_s18 }
   0xa   :  { %p274_p6 = por %p273_p5, %p272_p4 }
   0xc   :  { %p275_p7 = pnand %p274_p6, %p268_p3 }
   0xe   :  { %278 = shalt.err (!%p275_p7)
}
   0xf   :  { %s282_s19 = smov 128   ;;  %s283_s20 = smov 8  }
  0x10   :  { %21 = dma.hbm_to_vmem [thread:$0]  %s321_s1, 1280, %s16_s10, [#allocation3], %s282_s19, %s282_s19, %s283_s20  }
  0x11   :  { %279 = dma.done.wait [#allocation3], 1280  }
  0x12   :  { %280 = vsyncadd [#allocation3], 4294966016  ;;  %v284_v0 = vmov 0.0   ;;  %vm285_vm0 = vmmov 0   ;;  %v286_v1 = vmov 0.0|0.0   ;;  %vm41_vm1 = vcmask 64512  }
  0x13   :  { %215 = vmatprep.subr.mxu0 %v284_v0  ;;  %217 = vmatprep.mubr.msk.f32.mxu0 %vm285_vm0, %v284_v0  ;;  %v25_v2 = vld [vmem:[#allocation2] sm:$0xff]  ;;  %v28_v4 = vld [vmem:[#allocation2 + $0x10] sm:$0xff]  ;;  %v29_v5 = vld [vmem:[#allocation2 + $0x18] sm:$0xff]  ;;  %vm120_vm2 = vcmask 523264  }
  0x14   :  { %239 = vmatprep.subr.bf16.mxu1 %v286_v1  ;;  %236 = vmatprep.mubr.msk.f32.mxu1 %vm285_vm0, %v284_v0  ;;  %v36_v3 = vld [vmem:[%s320_s0] sm:$0xff]  ;;  %v31_v7 = vld [vmem:[#allocation2 + $0x28] sm:$0xff]  ;;  %v240_v8 = vpack.c.bf16 %v29_v5, %v28_v4  ;;  %v32_v10 = vld [vmem:[#allocation2 + $0x30] sm:$0xff] }
  0x15   :  { %216 = vmatpush3.msra.mxu0 %v25_v2  ;;  %v30_v6 = vld [vmem:[#allocation2 + $0x20] sm:$0xff]  ;;  %v33_v11 = vld [vmem:[#allocation2 + $0x38] sm:$0xff]  ;;  %v35_v14 = vld [vmem:[#allocation2 + $0x48] sm:$0xff] }
  0x16   :  { %218 = vmatmul.mubr.msk.f32.vlgmr.msra.gmra.mrb[0].mxu0 %vm41_vm1, %v36_v3  ;;  %241 = vmatpush3.bf16.msra.mxu1 %v240_v8  ;;  %v243_v9 = vpack.c.bf16 %v31_v7, %v30_v6  ;;  %v246_v12 = vpack.c.bf16 %v33_v11, %v32_v10  ;;  %v34_v13 = vld [vmem:[#allocation2 + $0x40] sm:$0xff]  ;;  %v200_v16 = vld [vmem:[#allocation2 + $0x8] ss:$0 sm:$0xff]  ;;  %v202_v21 = vld [vmem:[#allocation2 + $0x9] ss:$0 sm:$0xff] }
  0x17   :  { %242 = vmatprep.subr.bf16.mxu1 %v286_v1  ;;  %v249_v15 = vpack.c.bf16 %v35_v14, %v34_v13 }
  0x1a   :  { %244 = vmatpush3.bf16.msra.mxu1 %v243_v9 }
  0x1b   :  { %245 = vmatprep.subr.bf16.mxu1 %v286_v1 }
  0x1e   :  { %247 = vmatpush3.bf16.msra.mxu1 %v246_v12 }
  0x1f   :  { %248 = vmatprep.subr.bf16.mxu1 %v286_v1 }
  0x22   :  { %250 = vmatpush3.bf16.msra.mxu1 %v249_v15 }
  0xe9   :  { %v111_v17 = vpop.f32.mrb[0].mxu0 }
  0xea   :  { %v112_v18 = vadd.f32 %v200_v16, %v111_v17  ;;  %v219_v19 = vpop.f32.mrb[1].mxu0 }
  0xec   :  { %v115_v20 = vmax.f32 %v112_v18, 0.0 }
  0xee   :  { %237 = vmatmul.mubr.msk.f32.vlgmr.msra.gmra.mrb[0].mxu1 %vm120_vm2, %v115_v20 }
 0x1c1   :  { %v190_v22 = vpop.f32.mrb[0].mxu1 }
 0x1c2   :  { %v191_v23 = vadd.f32 %v202_v21, %v190_v22  ;;  %v238_v24 = vpop.f32.mrb[1].mxu1 }
 0x1c4   :  { %194 = vst [vmem:[%s322_s2] sm:$0xff] %v191_v23 }
 0x1c5   :  { %199 = vsyncpa [#allocation3], 1 }

</bundles_post_ra>
